<compile_context>
chip_gen: v7x
topology: tpu7x:2x2x1
jax: 0.10.0
libtpu: 0.0.40
codegen_flags: <defaults>
</compile_context>

<pallas_src>
import functools

import jax
import jax.numpy as jnp
from jax import lax
from jax.experimental import pallas as pl
from jax.experimental.pallas import tpu as pltpu

HIGH = lax.Precision.HIGHEST   # only used by the pure-JAX reference
LEAKY_SLOPE = 0.01             # nn.LeakyReLU default


# --------------------------------- kernel ---------------------------------
def _tfa_kernel(x_ref, wa_ref, wbc_ref, out_ref):
    # x_ref  : (n, s, G*c)        one group of parts, channels-last
    # wa_ref : (3*G*c, 2*G*h)     first convs of both branches (im2col taps,
    #                             block-diagonal over parts), bf16
    # wbc_ref: (3*2*G*h, 2*G*c)   second convs of both branches, bf16
    # out_ref: (n, G*c)           temporal-max aggregated features
    n, s, gc = x_ref.shape
    gh2 = wa_ref.shape[1]                       # 2 * G * hidden
    f32 = jnp.float32
    NEG = jnp.float32(-1e30)                    # -inf stand-in for max-pool pad

    x = x_ref[...]                              # (n, s, GC), f32

    def pad_s(v, fill):
        """Pad v along the s axis with a full s-sized block of `fill` on each
        side (tile-aligned concat) -> (n, 3*s, C)."""
        vn, vs, vc = v.shape
        pad = jnp.full((vn, vs, vc), fill, v.dtype)
        return jnp.concatenate([pad, v, pad], axis=1)

    def window(pv, off):
        """pv is [pad | v | pad]; rows t of the window are v[t + off] with the
        pad fill outside [0, s)."""
        return pv[:, s + off: 2 * s + off, :]

    def mm(a, b):
        # b (weights) is already bf16; bf16 MXU pass with f32 accumulation.
        return jnp.dot(a.astype(jnp.bfloat16), b, preferred_element_type=f32)

    def leaky(v):
        return jnp.where(v > 0, v, LEAKY_SLOPE * v)

    x_zp = pad_s(x, 0.0)                        # zero pad: conv taps + avg pools
    x_np = pad_s(x, NEG)                        # -inf pad: max pools

    # --- first convs (k=3, pad=1) of BOTH branches, all parts: 1 matmul ----
    x3 = jnp.concatenate([window(x_zp, -1), x, window(x_zp, 1)], axis=-1)
    hg = leaky(mm(x3.reshape(n * s, 3 * gc), wa_ref[...]))      # (n*s, 2*G*h)

    # --- second convs of BOTH branches, all parts: 1 matmul ----------------
    # (3x1 branch uses only the offset-0 tap of its hidden half; 3x3 branch
    #  uses all three taps of its half -- encoded in the zero rows of wbc.)
    hg3 = hg.reshape(n, s, gh2)
    hg_zp = pad_s(hg3, 0.0)
    hgsh = jnp.concatenate([window(hg_zp, -1), hg3, window(hg_zp, 1)], axis=-1)
    logits = mm(hgsh.reshape(n * s, 3 * gh2), wbc_ref[...])     # (n*s, 2*G*c)
    scores = jax.nn.sigmoid(logits).reshape(n, s, 2 * gc)
    scores31 = scores[:, :, :gc]
    scores33 = scores[:, :, gc:]

    # --- pooling (avg counts zero padding; max pads with -inf) -------------
    zm1, zp1 = window(x_zp, -1), window(x_zp, 1)
    zm2, zp2 = window(x_zp, -2), window(x_zp, 2)
    avg3 = (zm1 + x + zp1) * (1.0 / 3.0)
    avg5 = (zm2 + zm1 + x + zp1 + zp2) * (1.0 / 5.0)
    max3 = jnp.maximum(jnp.maximum(window(x_np, -1), x), window(x_np, 1))
    max5 = jnp.maximum(jnp.maximum(max3, window(x_np, -2)), window(x_np, 2))

    feat = (avg3 + max3) * scores31 + (avg5 + max5) * scores33  # (n, s, GC)
    out_ref[...] = jnp.max(feat, axis=1)                        # (n, GC)


# --------------------------- weight preparation ----------------------------
def _block_diag(w):
    """(G, a, b) -> (G*a, G*b) block-diagonal matrix."""
    g, a, b = w.shape
    eye = jnp.eye(g, dtype=w.dtype)
    return jnp.einsum("gab,gk->gakb", w, eye).reshape(g * a, g * b)


def _pack_weights(w13a, w13b, w33a, w33b, group):
    """Per-part conv weights -> per-grid-step fused block-diagonal matrices.

    w13a, w33a: (p, 3, c, h)  first conv of each branch, layout (tap, in, out)
    w13b      : (p, h, c)     3x1-branch second conv (kernel size 1)
    w33b      : (p, 3, h, c)  3x3-branch second conv, layout (tap, in, out)
    Returns bf16 arrays:
      WA  (steps, 3*G*c, 2*G*h)    rows = tap blocks (offset -1,0,+1),
                                   cols = [3x1 hidden | 3x3 hidden]
      WBC (steps, 3*2*G*h, 2*G*c)  rows = tap blocks of [3x1 hid | 3x3 hid],
                                   cols = [logits3x1 | logits3x3]
    """
    p, _, c, h = w13a.shape
    G = group
    steps = p // G
    GC, GH = G * c, G * h
    zeros = jnp.zeros((GH, GC), w13a.dtype)

    was, wbcs = [], []
    for i in range(steps):
        sl = slice(i * G, (i + 1) * G)
        a31, a33 = w13a[sl], w33a[sl]           # (G, 3, c, h)
        b31, b33 = w13b[sl], w33b[sl]           # (G, h, c), (G, 3, h, c)

        wa = jnp.concatenate(
            [jnp.concatenate(
                [_block_diag(a31[:, j]), _block_diag(a33[:, j])], axis=1)
             for j in range(3)],
            axis=0)                                              # (3GC, 2GH)

        rows = []
        for j in range(3):
            h1_rows = jnp.concatenate(
                [_block_diag(b31) if j == 1 else zeros, zeros], axis=1)
            g1_rows = jnp.concatenate([zeros, _block_diag(b33[:, j])], axis=1)
            rows += [h1_rows, g1_rows]
        wbc = jnp.concatenate(rows, axis=0)                      # (6GH, 2GC)

        was.append(wa)
        wbcs.append(wbc)

    return (jnp.stack(was).astype(jnp.bfloat16),
            jnp.stack(wbcs).astype(jnp.bfloat16))


# -------------------------------- wrapper ----------------------------------
@functools.partial(jax.jit, static_argnames=("group",))
def temporal_feature_aggregator(x_ncsp, w13a, w13b, w33a, w33b, *, group=8):
    """x_ncsp: [n, c, s, p]  ->  [n, c, p]  (matches the PyTorch module)."""
    n, c, s, p = x_ncsp.shape
    h = w13a.shape[-1]
    G = min(group, p)
    while p % G:                      # fall back to a divisor of p
        G -= 1
    steps = p // G
    GC, GH = G * c, G * h

    # parts-major, channels-last, grouped: (steps, n, s, G*c); part = step*G+g
    xg = jnp.transpose(x_ncsp, (3, 0, 2, 1)).astype(jnp.float32)  # (p, n, s, c)
    xg = (xg.reshape(steps, G, n, s, c)
            .transpose(0, 2, 3, 1, 4)
            .reshape(steps, n, s, GC))

    wa, wbc = _pack_weights(w13a, w13b, w33a, w33b, G)

    out = pl.pallas_call(
        _tfa_kernel,
        out_shape=jax.ShapeDtypeStruct((steps, n, GC), jnp.float32),
        grid=(steps,),
        in_specs=[
            pl.BlockSpec((None, n, s, GC), lambda i: (i, 0, 0, 0)),
            pl.BlockSpec((None, 3 * GC, 2 * GH), lambda i: (i, 0, 0)),
            pl.BlockSpec((None, 6 * GH, 2 * GC), lambda i: (i, 0, 0)),
        ],
        out_specs=pl.BlockSpec((None, n, GC), lambda i: (i, 0, 0)),
        compiler_params=pltpu.CompilerParams(
            dimension_semantics=("parallel",)),   # 2 steps -> both v7x TCs
    )(xg, wa, wbc)

    # (steps, n, G*c) -> (n, c, p)
    out = out.reshape(steps, n, G, c)
    return jnp.transpose(out, (1, 3, 0, 2)).reshape(n, c, p)


# ----------------------- pure-JAX reference (checking) ---------------------
def reference(x, W1_31, W2_31, W1_33, W2_33):
    n, c, s, p = x.shape

    def conv1d(v, w, pad):
        return lax.conv_general_dilated(
            v, w, (1,), [(pad, pad)],
            dimension_numbers=("NCH", "OIH", "NCH"), precision=HIGH)

    def leaky(v):
        return jnp.where(v > 0, v, LEAKY_SLOPE * v)

    def avgp(v, k, pad):
        return lax.reduce_window(
            v, jnp.asarray(0.0, v.dtype), lax.add,
            (1, 1, k), (1, 1, 1), [(0, 0), (0, 0), (pad, pad)]) / k

    def maxp(v, k, pad):
        return lax.reduce_window(
            v, jnp.asarray(-jnp.inf, v.dtype), lax.max,
            (1, 1, k), (1, 1, 1), [(0, 0), (0, 0), (pad, pad)])

    outs = []
    for i in range(p):
        xi = x[:, :, :, i]  # (n, c, s)
        lg31 = conv1d(leaky(conv1d(xi, W1_31[i], 1)), W2_31[i], 0)
        lg33 = conv1d(leaky(conv1d(xi, W1_33[i], 1)), W2_33[i], 1)
        f31 = (avgp(xi, 3, 1) + maxp(xi, 3, 1)) * jax.nn.sigmoid(lg31)
        f33 = (avgp(xi, 5, 2) + maxp(xi, 5, 2)) * jax.nn.sigmoid(lg33)
        outs.append(jnp.max(f31 + f33, axis=-1))  # (n, c)
    return jnp.stack(outs, axis=-1)  # (n, c, p)


if __name__ == "__main__":
    # Shapes consistent with the module: parts_num=16, squeeze=4.
    n, c, s, p = 2, 32, 8, 16
    squeeze = 4
    h = c // squeeze

    key = jax.random.PRNGKey(0)
    kx, k1, k2, k3, k4 = jax.random.split(key, 5)

    x = jax.random.normal(kx, (n, c, s, p), dtype=jnp.float32)

    # Per-part conv weights in PyTorch Conv1d layout [out, in, k], no bias.
    W1_31 = 0.1 * jax.random.normal(k1, (p, h, c, 3), dtype=jnp.float32)
    W2_31 = 0.1 * jax.random.normal(k2, (p, c, h, 1), dtype=jnp.float32)
    W1_33 = 0.1 * jax.random.normal(k3, (p, h, c, 3), dtype=jnp.float32)
    W2_33 = 0.1 * jax.random.normal(k4, (p, c, h, 3), dtype=jnp.float32)

    # Re-layout weights for the kernel: (tap, in, out).
    w13a = jnp.transpose(W1_31, (0, 3, 2, 1))          # (p, 3, c, h)
    w13b = jnp.transpose(W2_31[..., 0], (0, 2, 1))     # (p, h, c)
    w33a = jnp.transpose(W1_33, (0, 3, 2, 1))          # (p, 3, c, h)
    w33b = jnp.transpose(W2_33, (0, 3, 2, 1))          # (p, 3, h, c)

    out = temporal_feature_aggregator(x, w13a, w13b, w33a, w33b)
    out = jax.block_until_ready(out)

    ref = jax.block_until_ready(reference(x, W1_31, W2_31, W1_33, W2_33))

    assert out.shape == (n, c, p), out.shape
    assert jnp.allclose(out, ref, rtol=2e-2, atol=2e-2), (
        float(jnp.max(jnp.abs(out - ref))))

    print("KERNEL_OK")
</pallas_src>

<mosaic_0001>
module attributes {stable_mosaic.version = 11 : i64} {
  func.func @_tfa_kernel(%arg0: i32, %arg1: memref<1x2x8x256xf32, #tpu.memory_space<vmem>>, %arg2: memref<1x768x128xbf16, #tpu.memory_space<vmem>>, %arg3: memref<1x384x512xbf16, #tpu.memory_space<vmem>>, %arg4: memref<1x2x256xf32, #tpu.memory_space<vmem>>) attributes {dimension_semantics = [#tpu.dimension_semantics<parallel>], iteration_bounds = array<i64: 2>, scalar_prefetch = 0 : i64, scratch_operands = 0 : i64, tpu.core_type = #tpu.core_type<tc>, window_params = [{transform_indices = @transform_0, window_bounds = array<i64: 1, 2, 8, 256>}, {transform_indices = @transform_1, window_bounds = array<i64: 1, 768, 128>}, {transform_indices = @transform_2, window_bounds = array<i64: 1, 384, 512>}, {transform_indices = @transform_3, window_bounds = array<i64: 1, 2, 256>}]} {
    %c0 = arith.constant 0 : index
    %c0_0 = arith.constant 0 : index
    %c0_1 = arith.constant 0 : index
    %c0_2 = arith.constant 0 : index
    %0 = vector.load %arg1[%c0, %c0_0, %c0_1, %c0_2] : memref<1x2x8x256xf32, #tpu.memory_space<vmem>>, vector<1x2x8x256xf32>
    %1 = vector.shape_cast %0 : vector<1x2x8x256xf32> to vector<2x8x256xf32>
    %cst = arith.constant 0.000000e+00 : f32
    %2 = vector.broadcast %cst : f32 to vector<2x8x256xf32>
    %3 = tpu.concatenate %2, %1, %2 in 1 : vector<2x8x256xf32>, vector<2x8x256xf32>, vector<2x8x256xf32> -> vector<2x24x256xf32>
    %cst_3 = arith.constant -1.000000e+30 : f32
    %4 = vector.broadcast %cst_3 : f32 to vector<2x8x256xf32>
    %5 = tpu.concatenate %4, %1, %4 in 1 : vector<2x8x256xf32>, vector<2x8x256xf32>, vector<2x8x256xf32> -> vector<2x24x256xf32>
    %6 = vector.extract_strided_slice %3 {offsets = [0, 7, 0], sizes = [2, 8, 256], strides = [1, 1, 1]} : vector<2x24x256xf32> to vector<2x8x256xf32>
    %7 = vector.extract_strided_slice %3 {offsets = [0, 9, 0], sizes = [2, 8, 256], strides = [1, 1, 1]} : vector<2x24x256xf32> to vector<2x8x256xf32>
    %8 = tpu.concatenate %6, %1, %7 in 2 : vector<2x8x256xf32>, vector<2x8x256xf32>, vector<2x8x256xf32> -> vector<2x8x768xf32>
    %9 = vector.shape_cast %8 : vector<2x8x768xf32> to vector<16x768xf32>
    %c0_4 = arith.constant 0 : index
    %c0_5 = arith.constant 0 : index
    %c0_6 = arith.constant 0 : index
    %10 = vector.load %arg2[%c0_4, %c0_5, %c0_6] : memref<1x768x128xbf16, #tpu.memory_space<vmem>>, vector<1x768x128xbf16>
    %11 = vector.shape_cast %10 : vector<1x768x128xbf16> to vector<768x128xbf16>
    %12 = arith.truncf %9 : vector<16x768xf32> to vector<16x768xbf16>
    %cst_7 = arith.constant dense<0.000000e+00> : vector<16x128xf32>
    %13 = tpu.matmul %12, %11, %cst_7 {dimension_numbers = #tpu.dot_dimension_numbers<[1], [0], [0], [1], [0, 0, 1, 1], [], []>} : vector<16x768xbf16>, vector<768x128xbf16>, vector<16x128xf32> -> vector<16x128xf32>
    %cst_8 = arith.constant 0.000000e+00 : f32
    %14 = vector.broadcast %cst_8 : f32 to vector<16x128xf32>
    %15 = arith.cmpf ogt, %13, %14 : vector<16x128xf32>
    %cst_9 = arith.constant 0.00999999977 : f32
    %16 = vector.broadcast %cst_9 : f32 to vector<16x128xf32>
    %17 = arith.mulf %16, %13 : vector<16x128xf32>
    %18 = arith.select %15, %13, %17 : vector<16x128xi1>, vector<16x128xf32>
    %19 = vector.shape_cast %18 : vector<16x128xf32> to vector<2x8x128xf32>
    %cst_10 = arith.constant 0.000000e+00 : f32
    %20 = vector.broadcast %cst_10 : f32 to vector<2x8x128xf32>
    %21 = tpu.concatenate %20, %19, %20 in 1 : vector<2x8x128xf32>, vector<2x8x128xf32>, vector<2x8x128xf32> -> vector<2x24x128xf32>
    %22 = vector.extract_strided_slice %21 {offsets = [0, 7, 0], sizes = [2, 8, 128], strides = [1, 1, 1]} : vector<2x24x128xf32> to vector<2x8x128xf32>
    %23 = vector.extract_strided_slice %21 {offsets = [0, 9, 0], sizes = [2, 8, 128], strides = [1, 1, 1]} : vector<2x24x128xf32> to vector<2x8x128xf32>
    %24 = tpu.concatenate %22, %19, %23 in 2 : vector<2x8x128xf32>, vector<2x8x128xf32>, vector<2x8x128xf32> -> vector<2x8x384xf32>
    %25 = vector.shape_cast %24 : vector<2x8x384xf32> to vector<16x384xf32>
    %c0_11 = arith.constant 0 : index
    %c0_12 = arith.constant 0 : index
    %c0_13 = arith.constant 0 : index
    %26 = vector.load %arg3[%c0_11, %c0_12, %c0_13] : memref<1x384x512xbf16, #tpu.memory_space<vmem>>, vector<1x384x512xbf16>
    %27 = vector.shape_cast %26 : vector<1x384x512xbf16> to vector<384x512xbf16>
    %28 = arith.truncf %25 : vector<16x384xf32> to vector<16x384xbf16>
    %cst_14 = arith.constant dense<0.000000e+00> : vector<16x512xf32>
    %29 = tpu.matmul %28, %27, %cst_14 {dimension_numbers = #tpu.dot_dimension_numbers<[1], [0], [0], [1], [0, 0, 1, 1], [], []>} : vector<16x384xbf16>, vector<384x512xbf16>, vector<16x512xf32> -> vector<16x512xf32>
    %30 = arith.negf %29 : vector<16x512xf32>
    %31 = math.exp %30 : vector<16x512xf32>
    %cst_15 = arith.constant 1.000000e+00 : f32
    %32 = vector.broadcast %cst_15 : f32 to vector<16x512xf32>
    %33 = arith.addf %32, %31 : vector<16x512xf32>
    %34 = arith.divf %32, %33 : vector<16x512xf32>
    %35 = vector.shape_cast %34 : vector<16x512xf32> to vector<2x8x512xf32>
    %36 = vector.extract_strided_slice %35 {offsets = [0, 0, 0], sizes = [2, 8, 256], strides = [1, 1, 1]} : vector<2x8x512xf32> to vector<2x8x256xf32>
    %37 = vector.extract_strided_slice %35 {offsets = [0, 0, 256], sizes = [2, 8, 256], strides = [1, 1, 1]} : vector<2x8x512xf32> to vector<2x8x256xf32>
    %38 = vector.extract_strided_slice %3 {offsets = [0, 7, 0], sizes = [2, 8, 256], strides = [1, 1, 1]} : vector<2x24x256xf32> to vector<2x8x256xf32>
    %39 = vector.extract_strided_slice %3 {offsets = [0, 9, 0], sizes = [2, 8, 256], strides = [1, 1, 1]} : vector<2x24x256xf32> to vector<2x8x256xf32>
    %40 = vector.extract_strided_slice %3 {offsets = [0, 6, 0], sizes = [2, 8, 256], strides = [1, 1, 1]} : vector<2x24x256xf32> to vector<2x8x256xf32>
    %41 = vector.extract_strided_slice %3 {offsets = [0, 10, 0], sizes = [2, 8, 256], strides = [1, 1, 1]} : vector<2x24x256xf32> to vector<2x8x256xf32>
    %42 = arith.addf %38, %1 : vector<2x8x256xf32>
    %43 = arith.addf %42, %39 : vector<2x8x256xf32>
    %cst_16 = arith.constant 0.333333343 : f32
    %44 = vector.broadcast %cst_16 : f32 to vector<2x8x256xf32>
    %45 = arith.mulf %43, %44 : vector<2x8x256xf32>
    %46 = arith.addf %40, %38 : vector<2x8x256xf32>
    %47 = arith.addf %46, %1 : vector<2x8x256xf32>
    %48 = arith.addf %47, %39 : vector<2x8x256xf32>
    %49 = arith.addf %48, %41 : vector<2x8x256xf32>
    %cst_17 = arith.constant 2.000000e-01 : f32
    %50 = vector.broadcast %cst_17 : f32 to vector<2x8x256xf32>
    %51 = arith.mulf %49, %50 : vector<2x8x256xf32>
    %52 = vector.extract_strided_slice %5 {offsets = [0, 7, 0], sizes = [2, 8, 256], strides = [1, 1, 1]} : vector<2x24x256xf32> to vector<2x8x256xf32>
    %53 = arith.maximumf %52, %1 : vector<2x8x256xf32>
    %54 = vector.extract_strided_slice %5 {offsets = [0, 9, 0], sizes = [2, 8, 256], strides = [1, 1, 1]} : vector<2x24x256xf32> to vector<2x8x256xf32>
    %55 = arith.maximumf %53, %54 : vector<2x8x256xf32>
    %56 = vector.extract_strided_slice %5 {offsets = [0, 6, 0], sizes = [2, 8, 256], strides = [1, 1, 1]} : vector<2x24x256xf32> to vector<2x8x256xf32>
    %57 = arith.maximumf %55, %56 : vector<2x8x256xf32>
    %58 = vector.extract_strided_slice %5 {offsets = [0, 10, 0], sizes = [2, 8, 256], strides = [1, 1, 1]} : vector<2x24x256xf32> to vector<2x8x256xf32>
    %59 = arith.maximumf %57, %58 : vector<2x8x256xf32>
    %60 = arith.addf %45, %55 : vector<2x8x256xf32>
    %61 = arith.mulf %60, %36 : vector<2x8x256xf32>
    %62 = arith.addf %51, %59 : vector<2x8x256xf32>
    %63 = arith.mulf %62, %37 : vector<2x8x256xf32>
    %64 = arith.addf %61, %63 : vector<2x8x256xf32>
    %cst_18 = arith.constant dense<0xFF800000> : vector<2x256xf32>
    %65 = vector.multi_reduction <maximumf>, %64, %cst_18 [1] : vector<2x8x256xf32> to vector<2x256xf32>
    %c0_19 = arith.constant 0 : index
    %c0_20 = arith.constant 0 : index
    %c0_21 = arith.constant 0 : index
    %66 = vector.load %arg4[%c0_19, %c0_20, %c0_21] : memref<1x2x256xf32, #tpu.memory_space<vmem>>, vector<1x2x256xf32>
    %67 = vector.shape_cast %66 : vector<1x2x256xf32> to vector<2x256xf32>
    %68 = vector.shape_cast %65 : vector<2x256xf32> to vector<1x2x256xf32>
    tpu.vector_store %arg4[%c0_19, %c0_20, %c0_21], %68 {strides = array<i32>} : memref<1x2x256xf32, #tpu.memory_space<vmem>>, vector<1x2x256xf32>,
    return
  }
  func.func @transform_0(%arg0: i32) -> (i32, i32, i32, i32) {
    %c0_i32 = arith.constant 0 : i32
    %c0_i32_0 = arith.constant 0 : i32
    %c0_i32_1 = arith.constant 0 : i32
    %c0_i32_2 = arith.constant 0 : i32
    return %arg0, %c0_i32, %c0_i32_0, %c0_i32_1 : i32, i32, i32, i32
  }
  func.func @transform_1(%arg0: i32) -> (i32, i32, i32) {
    %c0_i32 = arith.constant 0 : i32
    %c0_i32_0 = arith.constant 0 : i32
    %c0_i32_1 = arith.constant 0 : i32
    return %arg0, %c0_i32, %c0_i32_0 : i32, i32, i32
  }
  func.func @transform_2(%arg0: i32) -> (i32, i32, i32) {
    %c0_i32 = arith.constant 0 : i32
    %c0_i32_0 = arith.constant 0 : i32
    %c0_i32_1 = arith.constant 0 : i32
    return %arg0, %c0_i32, %c0_i32_0 : i32, i32, i32
  }
  func.func @transform_3(%arg0: i32) -> (i32, i32, i32) {
    %c0_i32 = arith.constant 0 : i32
    %c0_i32_0 = arith.constant 0 : i32
    %c0_i32_1 = arith.constant 0 : i32
    return %arg0, %c0_i32, %c0_i32_0 : i32, i32, i32
  }
}

</mosaic_0001>

<bundles_post_ra>
// kernel: temporal_feature_aggregator.1
= control target key start
LH: loop header
LB: loop body
LE: loop exit
PB: predicated region body
PF: predicated region fallthrough
CT: control target
= control target key end

     0   :  { %s2589_s12 = smov 0   ;;  %s3119_s0 = inlined_call_operand.vmem [shape: f32[2,2,8,256], index: 0, kind: input, shape index: {}]   ;;  %s3120_s1 = inlined_call_operand.vmem [shape: bf16[2,768,128], index: 1, kind: input, shape index: {}]   ;;  %s3121_s2 = inlined_call_operand.vmem [shape: bf16[2,384,512], index: 2, kind: input, shape index: {}]   ;;  %s3122_s3 = inlined_call_operand.vmem [shape: f32[2,2,256], index: 3, kind: output, shape index: {}]  }
   0x1 LB: > { %s2072_s13 = sadd.s32 4294967295, %s2563_s12   ;;  %p2076_p0 = scmp.ge.s32.totalorder %s2563_s12, 1  ;;  %s2563_s12 = sphi %s2589_s12, %s13_s12  }
   0x2   : > { %p157_p1 = scmp.lt.s32.totalorder %s2563_s12, 3 }
   0x4   : > { %p158_p2 = pnand %p2076_p0, %p157_p1 }
   0x5   : > { %p191_p3 = scmp.lt.s32.totalorder (!%p158_p2), %s2072_s13, 1  ;;  %vm235_vm0 = vcmask (!%p158_p2), 1040384   ;;  %v2565_v4 = vmov (!%p158_p2), 0.0   ;;  %vm225_vm1 = vcmask (!%p158_p2), 1045504   ;;  %vm1659_vm4 = vcmask (!%p158_p2), 1046528  }
   0x6   : > { %161 = sbr.rel (%p158_p2) target bundleno = 625 (0x271), region = 32  ;;  %v2620_v5 = vrot.slane (!%p158_p2), %v2565_v4, 7  ;;  %v2662_v35 = vrot.slane (!%p158_p2), %v2565_v4, 2  ;;  %vm1681_vm5 = vcmask (!%p158_p2), 1044480   ;;  %vm1707_vm6 = vcmask (!%p158_p2), 1043456  }
   0x7   : > { %vm1922_vm7 = vcmask (!%p158_p2), 1047559   ;;  %vm1984_vm8 = vcmask (!%p158_p2), 1041409   ;;  %vm1986_vm9 = vcmask (!%p158_p2), 1043459   ;;  %vm1988_vm10 = vcmask (!%p158_p2), 1045509  }
   0xd   : > { %s3124_s13 = smov (!%p191_p3, %s2072_s13), 1 }
   0xe   : > { %s2315_s14 = smul.u32 384, %s3124_s13  ;;  %s2239_s15 = sshll.u32 %s3124_s13, 5 }
   0xf   : > { %s2604_s18 = scalar_lea.vmem %s3119_s0, %s2239_s15  ;;  %s2316_s22 = smul.u32 768, %s3124_s13 }
  0x10   : > { %s2609_s21 = scalar_lea.vmem %s3120_s1, %s2315_s14  ;;  %v2612_v0 = vld [vmem:[%s2604_s18 + $0x8] sm:$0xff]  ;;  %v2615_v1 = vld [vmem:[%s2604_s18 + $0x18] sm:$0xff]  ;;  %v2659_v34 = vld [vmem:[%s2604_s18] sm:$0xff]  ;;  %s2240_s26 = sshll.u32 %s3124_s13, 2 }
  0x11   : > { %v2329_v2 = vld [vmem:[%s2609_s21 + $0x40] sm:$0xff]   ;;  %v2624_v7 = vrot.slane %v2612_v0, 1  ;;  %v2628_v9 = vrot.slane %v2615_v1, 1  ;;  %v2333_v10 = vld [vmem:[%s2609_s21 + $0x48] sm:$0xff]   ;;  %v239_v11 = vrot.slane %v2612_v0, 7  ;;  %v253_v13 = vrot.slane %v2615_v1, 7  ;;  %s2730_s25 = scalar_lea.vmem %s3121_s2, %s2316_s22  ;;  %s210_s29 = scalar_lea.vmem %s3122_s3, %s2240_s26 }
  0x12   : > { %v2330_v3 = vld [vmem:[%s2609_s21 + $0xc0] sm:$0xff]   ;;  %2241 = vmatprep.subr.bf16.mxu0 %v2329_v2  ;;  %v2334_v12 = vld [vmem:[%s2609_s21 + $0xc8] sm:$0xff]   ;;  %v2337_v19 = vld [vmem:[%s2609_s21 + $0x50] sm:$0xff]   ;;  %v2666_v37 = vrot.slane %v2612_v0, 2  ;;  %v2671_v40 = vrot.slane %v2615_v1, 2  ;;  %v237_v43 = vrot.slane %v2659_v34, 7 }
  0x13   : > { %v2331_v6 = vld [vmem:[%s2609_s21] sm:$0xff]   ;;  %2263 = vmatprep.subr.bf16.mxu1 %v2330_v3  ;;  %v2335_v14 = vld [vmem:[%s2609_s21 + $0x8] sm:$0xff]   ;;  %v240_v15 = vsel %vm235_vm0, %v2620_v5, %v239_v11  ;;  %v254_v17 = vsel %vm235_vm0, %v2620_v5, %v253_v13  ;;  %v243_v18 = vrot.slane %v2624_v7, 7  ;;  %v257_v21 = vrot.slane %v2628_v9, 7  ;;  %v2338_v22 = vld [vmem:[%s2609_s21 + $0xd0] sm:$0xff]  }
  0x14   : > { %v2332_v8 = vld [vmem:[%s2609_s21 + $0x80] sm:$0xff]   ;;  %2242 = vmatpush3.bf16.msra.mxu0 %v2331_v6  ;;  %v2336_v16 = vld [vmem:[%s2609_s21 + $0x88] sm:$0xff]   ;;  %v374_v20 = vpack.c.bf16 %v254_v17, %v240_v15  ;;  %v2339_v23 = vld [vmem:[%s2609_s21 + $0x10] sm:$0xff]   ;;  %v2679_v44 = vsel %vm225_vm1, %v2666_v37, %v2662_v35  ;;  %v2683_v46 = vrot.slane %v2659_v34, 1  ;;  %v2689_v48 = vsel %vm225_vm1, %v2671_v40, %v2662_v35 }
  0x15   : > { %2264 = vmatpush3.bf16.msra.mxu1 %v2332_v8  ;;  %2243 = vmatprep.subr.bf16.mxu0 %v2333_v10  ;;  %v376_v24 = vpack.c.bf16 %v257_v21, %v243_v18  ;;  %v2340_v25 = vld [vmem:[%s2609_s21 + $0x90] sm:$0xff]   ;;  %v2341_v26 = vld [vmem:[%s2609_s21 + $0x58] sm:$0xff]   ;;  %v2345_v30 = vld [vmem:[%s2609_s21 + $0x60] sm:$0xff]   ;;  %v248_v49 = vrot.slane %v2666_v37, 7  ;;  %v249_v51 = vrot.slane %v2679_v44, 7  ;;  %v262_v53 = vrot.slane %v2671_v40, 7 }
  0x16   : > { %2265 = vmatprep.subr.bf16.mxu1 %v2334_v12  ;;  %699 = vmatprep.mubr.bf16.mxu0 %v374_v20  ;;  %v2342_v27 = vld [vmem:[%s2609_s21 + $0xd8] sm:$0xff]   ;;  %v2346_v31 = vld [vmem:[%s2609_s21 + $0xe0] sm:$0xff]   ;;  %v2349_v36 = vld [vmem:[%s2609_s21 + $0x68] sm:$0xff]   ;;  %v263_v55 = vrot.slane %v2689_v48, 7  ;;  %v238_v59 = vsel %vm235_vm0, %v2620_v5, %v237_v43  ;;  %v241_v60 = vrot.slane %v2683_v46, 7 }
  0x17   : > { %740 = vmatprep.mubr.bf16.mxu1 %v376_v24  ;;  %v2343_v28 = vld [vmem:[%s2609_s21 + $0x18] sm:$0xff]   ;;  %v2347_v32 = vld [vmem:[%s2609_s21 + $0x20] sm:$0xff]   ;;  %v2350_v38 = vld [vmem:[%s2609_s21 + $0xe8] sm:$0xff]   ;;  %v250_v2 = vsel %vm235_vm0, %v248_v49, %v249_v51 }
  0x18   : > { %2244 = vmatpush3.bf16.msra.mxu0 %v2335_v14  ;;  %v2344_v29 = vld [vmem:[%s2609_s21 + $0x98] sm:$0xff]   ;;  %v2348_v33 = vld [vmem:[%s2609_s21 + $0xa0] sm:$0xff]   ;;  %v2351_v39 = vld [vmem:[%s2609_s21 + $0x28] sm:$0xff]   ;;  %v264_v3 = vsel %vm235_vm0, %v262_v53, %v263_v55 }
  0x19   : > { %2266 = vmatpush3.bf16.msra.mxu1 %v2336_v16  ;;  %2245 = vmatprep.subr.bf16.mxu0 %v2337_v19  ;;  %v2352_v41 = vld [vmem:[%s2609_s21 + $0xa8] sm:$0xff]   ;;  %v2353_v42 = vld [vmem:[%s2609_s21 + $0x70] sm:$0xff]   ;;  %v2357_v52 = vld [vmem:[%s2609_s21 + $0x78] sm:$0xff]   ;;  %v378_v15 = vpack.c.bf16 %v264_v3, %v250_v2 }
  0x1a   : > { %2267 = vmatprep.subr.bf16.mxu1 %v2338_v22  ;;  %v2354_v45 = vld [vmem:[%s2609_s21 + $0xf0] sm:$0xff]   ;;  %v2358_v54 = vld [vmem:[%s2609_s21 + $0xf8] sm:$0xff]   ;;  %v2361_v63 = vld [vmem:[%s2609_s21 + $0x140] sm:$0xff]  }
  0x1b   : > { %v2355_v47 = vld [vmem:[%s2609_s21 + $0x30] sm:$0xff]   ;;  %v2359_v56 = vld [vmem:[%s2609_s21 + $0x38] sm:$0xff]   ;;  %v2362_v10 = vld [vmem:[%s2609_s21 + $0x100] sm:$0xff]  }
  0x1c   : > { %2246 = vmatpush3.bf16.msra.mxu0 %v2339_v23  ;;  %v2356_v50 = vld [vmem:[%s2609_s21 + $0xb0] sm:$0xff]   ;;  %v2360_v57 = vld [vmem:[%s2609_s21 + $0xb8] sm:$0xff]   ;;  %v2363_v14 = vld [vmem:[%s2609_s21 + $0x148] sm:$0xff]  }
  0x1d   : > { %2268 = vmatpush3.bf16.msra.mxu1 %v2340_v25  ;;  %2247 = vmatprep.subr.bf16.mxu0 %v2341_v26  ;;  %v2701_v58 = vld [vmem:[%s2604_s18 + $0x10] sm:$0xff]  ;;  %v2364_v17 = vld [vmem:[%s2609_s21 + $0x108] sm:$0xff]   ;;  %v2367_v20 = vld [vmem:[%s2609_s21 + $0x158] sm:$0xff]   ;;  %v2738_v26 = vrot.slane %v2659_v34, 2 }
  0x1e   : > { %2269 = vmatprep.subr.bf16.mxu1 %v2342_v27  ;;  %v251_v61 = vrot.slane %v2701_v58, 7  ;;  %v2710_v62 = vrot.slane %v2701_v58, 1  ;;  %v2365_v18 = vld [vmem:[%s2609_s21 + $0x150] sm:$0xff]   ;;  %v2368_v21 = vld [vmem:[%s2609_s21 + $0x118] sm:$0xff]   ;;  %v2369_v22 = vld [vmem:[%s2609_s21 + $0x160] sm:$0xff]   ;;  %v2741_v27 = vrot.slane %v2701_v58, 2 }
  0x1f   : > { %v2366_v19 = vld [vmem:[%s2609_s21 + $0x110] sm:$0xff]   ;;  %v2370_v25 = vld [vmem:[%s2609_s21 + $0x120] sm:$0xff]   ;;  %v2375_v51 = vld [vmem:[%s2609_s21 + $0x178] sm:$0xff]  }
  0x20   : > { %2248 = vmatpush3.bf16.msra.mxu0 %v2343_v28  ;;  %v252_v6 = vsel %vm235_vm0, %v2620_v5, %v251_v61  ;;  %v255_v8 = vrot.slane %v2710_v62, 7  ;;  %v2377_v23 = vld [vmem:[%s2730_s25] ss:$16 sps:$4 sm:$0xff]   ;;  %v2379_v24 = vld [vmem:[%s2730_s25 + $0x4] ss:$16 sps:$4 sm:$0xff]   ;;  %v2371_v28 = vld [vmem:[%s2609_s21 + $0x168] sm:$0xff]  }
  0x21   : > { %2270 = vmatpush3.bf16.msra.mxu1 %v2344_v29  ;;  %2249 = vmatprep.subr.bf16.mxu0 %v2345_v30  ;;  %v373_v12 = vpack.c.bf16 %v252_v6, %v238_v59  ;;  %v2385_v29 = vld [vmem:[%s2730_s25 + $0x24] ss:$16 sps:$4 sm:$0xff]   ;;  %v2383_v30 = vld [vmem:[%s2730_s25 + $0x20] ss:$16 sps:$4 sm:$0xff]   ;;  %v259_v49 = vrot.slane %v2741_v27, 7 }
  0x22   : > { %2271 = vmatprep.subr.bf16.mxu1 %v2346_v31  ;;  %v375_v16 = vpack.c.bf16 %v255_v8, %v241_v60  ;;  %v2372_v31 = vld [vmem:[%s2609_s21 + $0x128] sm:$0xff]   ;;  %v2395_v53 = vld [vmem:[%s2730_s25 + $0x60] ss:$16 sps:$4 sm:$0xff]  }
  0x23   : > { %v2382_v55 = vld [vmem:[%s2730_s25 + $0xc] ss:$16 sps:$4 sm:$0xff]   ;;  %v2401_v59 = vld [vmem:[%s2730_s25 + $0x80] ss:$16 sps:$4 sm:$0xff]   ;;  %v2380_v60 = vld [vmem:[%s2730_s25 + $0x8] ss:$16 sps:$4 sm:$0xff]  }
  0x24   : > { %2250 = vmatpush3.bf16.msra.mxu0 %v2347_v32  ;;  %v2391_v32 = vld [vmem:[%s2730_s25 + $0x44] ss:$16 sps:$4 sm:$0xff]   ;;  %v2388_v2 = vld [vmem:[%s2730_s25 + $0x2c] ss:$16 sps:$4 sm:$0xff]   ;;  %v2386_v3 = vld [vmem:[%s2730_s25 + $0x28] ss:$16 sps:$4 sm:$0xff]  }
  0x25   : > { %2272 = vmatpush3.bf16.msra.mxu1 %v2348_v33  ;;  %2251 = vmatprep.subr.bf16.mxu0 %v2349_v36  ;;  %v2373_v33 = vld [vmem:[%s2609_s21 + $0x170] sm:$0xff]   ;;  %v2752_v36 = vsel %vm225_vm1, %v2738_v26, %v2662_v35  ;;  %v2394_v6 = vld [vmem:[%s2730_s25 + $0x4c] ss:$16 sps:$4 sm:$0xff]   ;;  %v2392_v8 = vld [vmem:[%s2730_s25 + $0x48] ss:$16 sps:$4 sm:$0xff]  }
  0x26   : > { %2273 = vmatprep.subr.bf16.mxu1 %v2350_v38  ;;  %v2757_v38 = vsel %vm225_vm1, %v2741_v27, %v2662_v35 }
  0x28   : > { %2252 = vmatpush3.bf16.msra.mxu0 %v2351_v39  ;;  %v2389_v39 = vld [vmem:[%s2730_s25 + $0x40] ss:$16 sps:$4 sm:$0xff]  }
  0x29   : > { %2274 = vmatpush3.bf16.msra.mxu1 %v2352_v41  ;;  %2253 = vmatprep.subr.bf16.mxu0 %v2353_v42  ;;  %v245_v41 = vrot.slane %v2738_v26, 7  ;;  %v2397_v42 = vld [vmem:[%s2730_s25 + $0x64] ss:$16 sps:$4 sm:$0xff]  }
  0x2a   : > { %2275 = vmatprep.subr.bf16.mxu1 %v2354_v45  ;;  %v2374_v45 = vld [vmem:[%s2609_s21 + $0x130] sm:$0xff]  }
  0x2c   : > { %2254 = vmatpush3.bf16.msra.mxu0 %v2355_v47  ;;  %v246_v47 = vrot.slane %v2752_v36, 7 }
  0x2d   : > { %2276 = vmatpush3.bf16.msra.mxu1 %v2356_v50  ;;  %2255 = vmatprep.subr.bf16.mxu0 %v2357_v52  ;;  %v260_v50 = vrot.slane %v2757_v38, 7  ;;  %v2376_v52 = vld [vmem:[%s2609_s21 + $0x138] sm:$0xff]  }
  0x2e   : > { %2277 = vmatprep.subr.bf16.mxu1 %v2358_v54  ;;  %v2403_v54 = vld [vmem:[%s2730_s25 + $0x84] ss:$16 sps:$4 sm:$0xff]  }
  0x30   : > { %2256 = vmatpush3.bf16.msra.mxu0 %v2359_v56  ;;  %v247_v56 = vsel %vm235_vm0, %v245_v41, %v246_v47  ;;  %v2436_v41 = vld [vmem:[%s2730_s25 + $0x12c] ss:$16 sps:$4 sm:$0xff]   ;;  %v2439_v47 = vld [vmem:[%s2730_s25 + $0x144] ss:$16 sps:$4 sm:$0xff]  }
  0x31   : > { %2278 = vmatpush3.bf16.msra.mxu1 %v2360_v57  ;;  %2285 = vmatprep.subr.bf16.mxu0 %v2361_v63  ;;  %v261_v57 = vsel %vm235_vm0, %v259_v49, %v260_v50  ;;  %v2442_v49 = vld [vmem:[%s2730_s25 + $0x14c] ss:$16 sps:$4 sm:$0xff]   ;;  %v2437_v50 = vld [vmem:[%s2730_s25 + $0x140] ss:$16 sps:$4 sm:$0xff]  }
  0x32   : > { %1403 = vmatprep.subr.bf16.mxu1 %v2379_v24  ;;  %v377_v63 = vpack.c.bf16 %v261_v57, %v247_v56  ;;  %v2421_v24 = vld [vmem:[%s2730_s25 + $0xe4] ss:$16 sps:$4 sm:$0xff]   ;;  %v2454_v57 = vld [vmem:[%s2730_s25 + $0x18c] ss:$16 sps:$4 sm:$0xff]  }
  0x33   : > { %700 = vmatmul.mubr.bf16.vlgmr.msra.gmra.mrb[0].mxu0 %v373_v12  ;;  %v2398_v12 = vld [vmem:[%s2730_s25 + $0x68] ss:$16 sps:$4 sm:$0xff]   ;;  %v2451_v56 = vld [vmem:[%s2730_s25 + $0x184] ss:$16 sps:$4 sm:$0xff]  }
  0x34   : > { %741 = vmatmul.mubr.bf16.vlgmr.msra.gmra.mrb[0].mxu1 %v375_v16  ;;  %2286 = vmatpush3.bf16.msra.mxu0 %v2362_v10  ;;  %v2400_v10 = vld [vmem:[%s2730_s25 + $0x6c] ss:$16 sps:$4 sm:$0xff]   ;;  %v2409_v16 = vld [vmem:[%s2730_s25 + $0xa4] ss:$16 sps:$4 sm:$0xff]  }
  0x35   : > { %2287 = vmatprep.subr.bf16.mxu0 %v2363_v14  ;;  %781 = vmatprep.mubr.bf16.mxu0 %v378_v15  ;;  %v2406_v14 = vld [vmem:[%s2730_s25 + $0x8c] ss:$16 sps:$4 sm:$0xff]   ;;  %v2404_v15 = vld [vmem:[%s2730_s25 + $0x88] ss:$16 sps:$4 sm:$0xff]  }
  0x36   : > { %1404 = vmatpush1.bf16.msra.mxu1 %v2377_v23  ;;  %v2416_v23 = vld [vmem:[%s2730_s25 + $0xc8] ss:$16 sps:$4 sm:$0xff]  }
  0x37   : > { %1405 = vmatprep.subr.bf16.mxu1 %v2385_v29  ;;  %v2422_v29 = vld [vmem:[%s2730_s25 + $0xe8] ss:$16 sps:$4 sm:$0xff]  }
  0x38   : > { %2288 = vmatpush3.bf16.msra.mxu0 %v2364_v17  ;;  %v2412_v17 = vld [vmem:[%s2730_s25 + $0xac] ss:$16 sps:$4 sm:$0xff]  }
  0x39   : > { %2289 = vmatprep.subr.bf16.mxu0 %v2365_v18  ;;  %v2407_v18 = vld [vmem:[%s2730_s25 + $0xa0] ss:$16 sps:$4 sm:$0xff]  }
  0x3a   : > { %1406 = vmatpush1.bf16.msra.mxu1 %v2383_v30  ;;  %v2427_v30 = vld [vmem:[%s2730_s25 + $0x104] ss:$16 sps:$4 sm:$0xff]  }
  0x3b   : > { %1407 = vmatprep.subr.bf16.mxu1 %v2391_v32  ;;  %v2425_v32 = vld [vmem:[%s2730_s25 + $0x100] ss:$16 sps:$4 sm:$0xff]  }
  0x3c   : > { %2290 = vmatpush3.bf16.msra.mxu0 %v2366_v19  ;;  %v2410_v19 = vld [vmem:[%s2730_s25 + $0xa8] ss:$16 sps:$4 sm:$0xff]  }
  0x3d   : > { %2291 = vmatprep.subr.bf16.mxu0 %v2367_v20  ;;  %v2415_v20 = vld [vmem:[%s2730_s25 + $0xc4] ss:$16 sps:$4 sm:$0xff]  }
  0x3e   : > { %1408 = vmatpush1.bf16.msra.mxu1 %v2389_v39  ;;  %v2433_v39 = vld [vmem:[%s2730_s25 + $0x124] ss:$16 sps:$4 sm:$0xff]  }
  0x3f   : > { %1409 = vmatprep.subr.bf16.mxu1 %v2397_v42  ;;  %v2431_v42 = vld [vmem:[%s2730_s25 + $0x120] ss:$16 sps:$4 sm:$0xff]  }
  0x40   : > { %2292 = vmatpush3.bf16.msra.mxu0 %v2368_v21  ;;  %v2418_v21 = vld [vmem:[%s2730_s25 + $0xcc] ss:$16 sps:$4 sm:$0xff]  }
  0x41   : > { %2293 = vmatprep.subr.bf16.mxu0 %v2369_v22  ;;  %v2413_v22 = vld [vmem:[%s2730_s25 + $0xc0] ss:$16 sps:$4 sm:$0xff]  }
  0x42   : > { %1410 = vmatpush1.bf16.msra.mxu1 %v2395_v53  ;;  %v2448_v53 = vld [vmem:[%s2730_s25 + $0x16c] ss:$16 sps:$4 sm:$0xff]  }
  0x43   : > { %1411 = vmatprep.subr.bf16.mxu1 %v2403_v54  ;;  %v2443_v54 = vld [vmem:[%s2730_s25 + $0x160] ss:$16 sps:$4 sm:$0xff]  }
  0x44   : > { %2294 = vmatpush3.bf16.msra.mxu0 %v2370_v25  ;;  %v2424_v25 = vld [vmem:[%s2730_s25 + $0xec] ss:$16 sps:$4 sm:$0xff]  }
  0x45   : > { %2295 = vmatprep.subr.bf16.mxu0 %v2371_v28  ;;  %v2419_v28 = vld [vmem:[%s2730_s25 + $0xe0] ss:$16 sps:$4 sm:$0xff]  }
  0x46   : > { %1412 = vmatpush1.bf16.msra.mxu1 %v2401_v59  ;;  %v2449_v59 = vld [vmem:[%s2730_s25 + $0x180] ss:$16 sps:$4 sm:$0xff]  }
  0x47   : > { %1413 = vmatprep.subr.bf16.mxu1 %v2409_v16  ;;  %v2467_v16 = vld [vmem:[%s2730_s25 + $0x1e0] ss:$16 sps:$4 sm:$0xff]  }
  0x48   : > { %2296 = vmatpush3.bf16.msra.mxu0 %v2372_v31  ;;  %v2430_v31 = vld [vmem:[%s2730_s25 + $0x10c] ss:$16 sps:$4 sm:$0xff]  }
  0x49   : > { %2297 = vmatprep.subr.bf16.mxu0 %v2373_v33  ;;  %v2428_v33 = vld [vmem:[%s2730_s25 + $0x108] ss:$16 sps:$4 sm:$0xff]  }
  0x4a   : > { %1414 = vmatpush1.bf16.msra.mxu1 %v2407_v18  ;;  %v2472_v18 = vld [vmem:[%s2730_s25 + $0x1ec] ss:$16 sps:$4 sm:$0xff]  }
  0x4b   : > { %1415 = vmatprep.subr.bf16.mxu1 %v2415_v20  ;;  %v2478_v20 = vld [vmem:[%s2730_s25 + $0x20c] ss:$16 sps:$4 sm:$0xff]  }
  0x4c   : > { %2298 = vmatpush3.bf16.msra.mxu0 %v2374_v45  ;;  %v2434_v45 = vld [vmem:[%s2730_s25 + $0x128] ss:$16 sps:$4 sm:$0xff]  }
  0x4d   : > { %2299 = vmatprep.subr.bf16.mxu0 %v2375_v51  ;;  %v2440_v51 = vld [vmem:[%s2730_s25 + $0x148] ss:$16 sps:$4 sm:$0xff]  }
  0x4e   : > { %1416 = vmatpush1.bf16.msra.mxu1 %v2413_v22 }
  0x4f   : > { %1417 = vmatprep.subr.bf16.mxu1 %v2421_v24 }
  0x50   : > { %2300 = vmatpush3.bf16.msra.mxu0 %v2376_v52  ;;  %v2445_v52 = vld [vmem:[%s2730_s25 + $0x164] ss:$16 sps:$4 sm:$0xff]  }
  0x51   : > { %1489 = vmatprep.subr.bf16.mxu0 %v2382_v55  ;;  %v2446_v55 = vld [vmem:[%s2730_s25 + $0x168] ss:$16 sps:$4 sm:$0xff]  }
  0x52   : > { %1418 = vmatpush1.bf16.msra.mxu1 %v2419_v28 }
  0x53   : > { %782 = vmatmul.mubr.bf16.vlgmr.msra.gmra.mrb[4].mxu0 %v377_v63  ;;  %1419 = vmatprep.subr.bf16.mxu1 %v2427_v30  ;;  %v2457_v63 = vld [vmem:[%s2730_s25 + $0x1a4] ss:$16 sps:$4 sm:$0xff]  }
  0x54   : > { %1490 = vmatpush1.bf16.msra.mxu0 %v2380_v60  ;;  %v2452_v60 = vld [vmem:[%s2730_s25 + $0x188] ss:$16 sps:$4 sm:$0xff]  }
  0x55   : > { %1491 = vmatprep.subr.bf16.mxu0 %v2388_v2  ;;  %v2460_v2 = vld [vmem:[%s2730_s25 + $0x1ac] ss:$16 sps:$4 sm:$0xff]  }
  0x56   : > { %1420 = vmatpush1.bf16.msra.mxu1 %v2425_v32 }
  0x57   : > { %1421 = vmatprep.subr.bf16.mxu1 %v2433_v39 }
  0x58   : > { %1492 = vmatpush1.bf16.msra.mxu0 %v2386_v3  ;;  %v2455_v3 = vld [vmem:[%s2730_s25 + $0x1a0] ss:$16 sps:$4 sm:$0xff]  }
  0x59   : > { %1493 = vmatprep.subr.bf16.mxu0 %v2394_v6  ;;  %v2458_v6 = vld [vmem:[%s2730_s25 + $0x1a8] ss:$16 sps:$4 sm:$0xff]  }
  0x5a   : > { %1422 = vmatpush1.bf16.msra.mxu1 %v2431_v42 }
  0x5b   : > { %1423 = vmatprep.subr.bf16.mxu1 %v2439_v47 }
  0x5c   : > { %1494 = vmatpush1.bf16.msra.mxu0 %v2392_v8  ;;  %v2463_v8 = vld [vmem:[%s2730_s25 + $0x1c4] ss:$16 sps:$4 sm:$0xff]  }
  0x5d   : > { %1495 = vmatprep.subr.bf16.mxu0 %v2400_v10  ;;  %v2466_v10 = vld [vmem:[%s2730_s25 + $0x1cc] ss:$16 sps:$4 sm:$0xff]  }
  0x5e   : > { %1424 = vmatpush1.bf16.msra.mxu1 %v2437_v50 }
  0x5f   : > { %1425 = vmatprep.subr.bf16.mxu1 %v2445_v52 }
  0x60   : > { %1496 = vmatpush1.bf16.msra.mxu0 %v2398_v12  ;;  %v2461_v12 = vld [vmem:[%s2730_s25 + $0x1c0] ss:$16 sps:$4 sm:$0xff]  }
  0x61   : > { %1497 = vmatprep.subr.bf16.mxu0 %v2406_v14  ;;  %v2464_v14 = vld [vmem:[%s2730_s25 + $0x1c8] ss:$16 sps:$4 sm:$0xff]  }
  0x62   : > { %1426 = vmatpush1.bf16.msra.mxu1 %v2443_v54 }
  0x63   : > { %1427 = vmatprep.subr.bf16.mxu1 %v2451_v56 }
  0x64   : > { %1498 = vmatpush1.bf16.msra.mxu0 %v2404_v15  ;;  %v2469_v15 = vld [vmem:[%s2730_s25 + $0x1e4] ss:$16 sps:$4 sm:$0xff]  }
  0x65   : > { %1499 = vmatprep.subr.bf16.mxu0 %v2412_v17  ;;  %v2470_v17 = vld [vmem:[%s2730_s25 + $0x1e8] ss:$16 sps:$4 sm:$0xff]  }
  0x66   : > { %1428 = vmatpush1.bf16.msra.mxu1 %v2449_v59 }
  0x67   : > { %1429 = vmatprep.subr.bf16.mxu1 %v2457_v63 }
  0x68   : > { %1500 = vmatpush1.bf16.msra.mxu0 %v2410_v19  ;;  %v2475_v19 = vld [vmem:[%s2730_s25 + $0x204] ss:$16 sps:$4 sm:$0xff]  }
  0x69   : > { %1501 = vmatprep.subr.bf16.mxu0 %v2418_v21 }
  0x6a   : > { %1430 = vmatpush1.bf16.msra.mxu1 %v2455_v3 }
  0x6b   : > { %1431 = vmatprep.subr.bf16.mxu1 %v2463_v8 }
  0x6c   : > { %1502 = vmatpush1.bf16.msra.mxu0 %v2416_v23 }
  0x6d   : > { %1503 = vmatprep.subr.bf16.mxu0 %v2424_v25 }
  0x6e   : > { %1432 = vmatpush1.bf16.msra.mxu1 %v2461_v12 }
  0x6f   : > { %1433 = vmatprep.subr.bf16.mxu1 %v2469_v15 }
  0x70   : > { %1504 = vmatpush1.bf16.msra.mxu0 %v2422_v29 }
  0x71   : > { %1505 = vmatprep.subr.bf16.mxu0 %v2430_v31 }
  0x72   : > { %1434 = vmatpush1.bf16.msra.mxu1 %v2467_v16  ;;  %v2473_v16 = vld [vmem:[%s2730_s25 + $0x200] ss:$16 sps:$4 sm:$0xff]  }
  0x73   : > { %1446 = vmatprep.subr.bf16.mxu1 %v2475_v19 }
  0x74   : > { %1506 = vmatpush1.bf16.msra.mxu0 %v2428_v33 }
  0x75   : > { %1507 = vmatprep.subr.bf16.mxu0 %v2436_v41 }
  0x78   : > { %1508 = vmatpush1.bf16.msra.mxu0 %v2434_v45 }
  0x79   : > { %1509 = vmatprep.subr.bf16.mxu0 %v2442_v49 }
  0x7c   : > { %1510 = vmatpush1.bf16.msra.mxu0 %v2440_v51 }
  0x7d   : > { %1511 = vmatprep.subr.bf16.mxu0 %v2448_v53 }
  0x80   : > { %1512 = vmatpush1.bf16.msra.mxu0 %v2446_v55 }
  0x81   : > { %1513 = vmatprep.subr.bf16.mxu0 %v2454_v57 }
  0x84   : > { %1514 = vmatpush1.bf16.msra.mxu0 %v2452_v60 }
  0x85   : > { %1515 = vmatprep.subr.bf16.mxu0 %v2460_v2 }
  0x88   : > { %1516 = vmatpush1.bf16.msra.mxu0 %v2458_v6 }
  0x89   : > { %1517 = vmatprep.subr.bf16.mxu0 %v2466_v10 }
  0x8c   : > { %1518 = vmatpush1.bf16.msra.mxu0 %v2464_v14 }
  0x8d   : > { %1519 = vmatprep.subr.bf16.mxu0 %v2472_v18 }
  0x90   : > { %1520 = vmatpush1.bf16.msra.mxu0 %v2470_v17  ;;  %v2476_v17 = vld [vmem:[%s2730_s25 + $0x208] ss:$16 sps:$4 sm:$0xff]  }
  0x91   : > { %1532 = vmatprep.subr.bf16.mxu0 %v2478_v20 }
 0x106   : > { %v2257_v21 = vpop.f32.mrb[0].mxu0 }
 0x107   : > { %v2279_v22 = vpop.f32.mrb[0].mxu1  ;;  %v2258_v23 = vpop.f32.mrb[1].mxu0 }
 0x108   : > { %v2259_v24 = vadd.f32 %v2258_v23, %v2257_v21  ;;  %v2280_v25 = vpop.f32.mrb[1].mxu1  ;;  %v2260_v28 = vpop.f32.mrb[2].mxu0  ;;  %v2481_v21 = vld [vmem:[%s2730_s25 + $0x224] ss:$16 sps:$4 sm:$0xff]  }
 0x109   : > { %v2281_v29 = vadd.f32 %v2280_v25, %v2279_v22  ;;  %v2282_v30 = vpop.f32.mrb[2].mxu1  ;;  %v2261_v31 = vpop.f32.mrb[3].mxu0  ;;  %v2484_v22 = vld [vmem:[%s2730_s25 + $0x22c] ss:$16 sps:$4 sm:$0xff]   ;;  %v2479_v25 = vld [vmem:[%s2730_s25 + $0x220] ss:$16 sps:$4 sm:$0xff]  }
 0x10a   : > { %v2262_v32 = vadd.f32 %v2261_v31, %v2260_v28  ;;  %v2283_v33 = vpop.f32.mrb[3].mxu1  ;;  %v2566_v31 = vmov 0  }
 0x10b   : > { %v743_v39 = vadd.f32 %v2281_v29, %v2259_v24  ;;  %v2284_v41 = vadd.f32 %v2283_v33, %v2282_v30  ;;  %v2487_v29 = vld [vmem:[%s2730_s25 + $0x244] ss:$16 sps:$4 sm:$0xff]   ;;  %v2490_v30 = vld [vmem:[%s2730_s25 + $0x24c] ss:$16 sps:$4 sm:$0xff]   ;;  %v2488_v33 = vld [vmem:[%s2730_s25 + $0x248] ss:$16 sps:$4 sm:$0xff]  }
 0x10d   : > { %v746_v42 = vadd.f32 %v2284_v41, %v2262_v32  ;;  %v2485_v32 = vld [vmem:[%s2730_s25 + $0x240] ss:$16 sps:$4 sm:$0xff]   ;;  %v2496_v41 = vld [vmem:[%s2730_s25 + $0x26c] ss:$16 sps:$4 sm:$0xff]  }
 0x126   : > { %v2301_v45 = vpop.f32.mrb[4].mxu0 }
 0x127   : > { %v2302_v47 = vpop.f32.mrb[5].mxu0 }
 0x128   : > { %v2303_v49 = vadd.f32 %v2302_v47, %v2301_v45  ;;  %v2304_v50 = vpop.f32.mrb[6].mxu0  ;;  %v2494_v45 = vld [vmem:[%s2730_s25 + $0x268] ss:$16 sps:$4 sm:$0xff]   ;;  %v2499_v47 = vld [vmem:[%s2730_s25 + $0x284] ss:$16 sps:$4 sm:$0xff]  }
 0x129   : > { %v2305_v51 = vpop.f32.mrb[7].mxu0 }
 0x12a   : > { %v784_v52 = vadd.f32 %v2303_v49, %v743_v39  ;;  %v2306_v53 = vadd.f32 %v2305_v51, %v2304_v50  ;;  %v2493_v39 = vld [vmem:[%s2730_s25 + $0x264] ss:$16 sps:$4 sm:$0xff]   ;;  %v2502_v49 = vld [vmem:[%s2730_s25 + $0x28c] ss:$16 sps:$4 sm:$0xff]   ;;  %v2497_v50 = vld [vmem:[%s2730_s25 + $0x280] ss:$16 sps:$4 sm:$0xff]  }
 0x12b   : > { %v2500_v51 = vld [vmem:[%s2730_s25 + $0x288] ss:$16 sps:$4 sm:$0xff]  }
 0x12c   : > { %vm790_vm2 = vcmp.gt.f32.partialorder %v784_v52, 0.0  ;;  %v792_v54 = vmul.f32 0.01, %v784_v52  ;;  %v787_v55 = vadd.f32 %v2306_v53, %v746_v42  ;;  %v2491_v42 = vld [vmem:[%s2730_s25 + $0x260] ss:$16 sps:$4 sm:$0xff]  }
 0x12d   : > { %v2508_v53 = vld [vmem:[%s2730_s25 + $0x2ac] ss:$16 sps:$4 sm:$0xff]  }
 0x12e   : > { %vm791_vm3 = vcmp.gt.f32.partialorder %v787_v55, 0.0  ;;  %v793_v56 = vmul.f32 0.01, %v787_v55  ;;  %v794_v57 = vsel %vm790_vm2, %v784_v52, %v792_v54  ;;  %v2505_v52 = vld [vmem:[%s2730_s25 + $0x2a4] ss:$16 sps:$4 sm:$0xff]  }
 0x12f   : > { %v800_v59 = vrot.slane %v794_v57, 2  ;;  %v804_v60 = vrot.slane %v794_v57, 7  ;;  %v2503_v54 = vld [vmem:[%s2730_s25 + $0x2a0] ss:$16 sps:$4 sm:$0xff]  }
 0x130   : > { %v795_v63 = vsel %vm791_vm3, %v787_v55, %v793_v56  ;;  %v2506_v55 = vld [vmem:[%s2730_s25 + $0x2a8] ss:$16 sps:$4 sm:$0xff]   ;;  %v2511_v56 = vld [vmem:[%s2730_s25 + $0x2c4] ss:$16 sps:$4 sm:$0xff]  }
 0x131   : > { %v801_v2 = vsel %vm225_vm1, %v800_v59, %v2662_v35  ;;  %v802_v3 = vrot.slane %v795_v63, 2  ;;  %v811_v6 = vrot.slane %v795_v63, 7  ;;  %v808_v8 = vrot.slane %v800_v59, 7  ;;  %v2509_v59 = vld [vmem:[%s2730_s25 + $0x2c0] ss:$16 sps:$4 sm:$0xff]  }
 0x132   : > { %v921_v10 = vpack.c.bf16 %v795_v63, %v794_v57  ;;  %v809_v12 = vrot.slane %v801_v2, 7  ;;  %v805_v18 = vsel %vm235_vm0, %v2620_v5, %v804_v60  ;;  %v2514_v57 = vld [vmem:[%s2730_s25 + $0x2cc] ss:$16 sps:$4 sm:$0xff]   ;;  %v2512_v60 = vld [vmem:[%s2730_s25 + $0x2c8] ss:$16 sps:$4 sm:$0xff]  }
 0x133   : > { %v803_v14 = vsel %vm225_vm1, %v802_v3, %v2662_v35  ;;  %v815_v15 = vrot.slane %v802_v3, 7  ;;  %v812_v19 = vsel %vm235_vm0, %v2620_v5, %v811_v6  ;;  %v2482_v5 = vld [vmem:[%s2730_s25 + $0x228] ss:$16 sps:$4 sm:$0xff]   ;;  %v2517_v63 = vld [vmem:[%s2730_s25 + $0x2e4] ss:$16 sps:$4 sm:$0xff]  }
 0x134   : > { %1435 = vmatprep.mubr.bf16.mxu1 %v921_v10  ;;  %1521 = vmatprep.mubr.bf16.mxu0 %v921_v10  ;;  %v920_v20 = vpack.c.bf16 %v812_v19, %v805_v18  ;;  %v816_v23 = vrot.slane %v803_v14, 7  ;;  %v810_v35 = vsel %vm235_vm0, %v808_v8, %v809_v12  ;;  %v2520_v2 = vld [vmem:[%s2730_s25 + $0x2ec] ss:$16 sps:$4 sm:$0xff]   ;;  %v2515_v3 = vld [vmem:[%s2730_s25 + $0x2e0] ss:$16 sps:$4 sm:$0xff]   ;;  %v2872_v12 = vrot.slane %v2565_v4, 1 }
 0x135   : > { %v2518_v6 = vld [vmem:[%s2730_s25 + $0x2e8] ss:$16 sps:$4 sm:$0xff]   ;;  %v2567_v8 = vmov -1e+30   ;;  %v1741_v14 = vmax.f32 %v2683_v46, -1e+30 }
 0x136   : > { %1436 = vmatmul.mubr.bf16.vlgmr.msra.gmra.mrb[4].mxu1 %v920_v20  ;;  %1522 = vmatmul.mubr.bf16.vlgmr.msra.gmra.mrb[8].mxu0 %v920_v20  ;;  %v817_v24 = vsel %vm235_vm0, %v815_v15, %v816_v23  ;;  %v2869_v10 = vrot.slane %v2567_v8, 2  ;;  %v1743_v15 = vmax.f32 %v2659_v34, %v2683_v46  ;;  %v1682_v19 = vrot.slane %v2659_v34, 3 }
 0x137   : > { %1447 = vmatpush1.bf16.msra.mxu1 %v2473_v16  ;;  %1533 = vmatpush1.bf16.msra.mxu0 %v2476_v17  ;;  %v922_v28 = vpack.c.bf16 %v817_v24, %v810_v35  ;;  %v2877_v16 = vrot.slane %v2567_v8, 7  ;;  %v1629_v17 = vadd.f32 %v2683_v46, %v2659_v34  ;;  %v2886_v20 = vrot.slane %v2565_v4, 3 }
 0x138   : > { %1448 = vmatprep.subr.bf16.mxu1 %v2481_v21  ;;  %1534 = vmatprep.subr.bf16.mxu0 %v2484_v22  ;;  %v1751_v18 = vsel %vm225_vm1, %v2738_v26, %v2869_v10  ;;  %v2889_v21 = vld [vmem:[%s2604_s18 + $0x8] sm:$0xff]  ;;  %v1661_v23 = vsel %vm1659_vm4, %v2872_v12, %v2683_v46  ;;  %v1752_v35 = vsel %vm225_vm1, %v2666_v37, %v2869_v10  ;;  %v2899_v24 = vrot.slane %v2567_v8, 3 }
 0x139   : > { %1478 = vmatprep.mubr.bf16.mxu1 %v2566_v31  ;;  %1564 = vmatprep.mubr.bf16.mxu0 %v2566_v31  ;;  %v1744_v22 = vmax.f32 %v2889_v21, %v2624_v7  ;;  %v1768_v31 = vsel %vm235_vm0, %v2877_v16, %v237_v43  ;;  %v1630_v34 = vadd.f32 %v2889_v21, %v2624_v7  ;;  %v2929_v43 = vrot.slane %v2889_v21, 3 }
 0x13a   : > { %v2947_v0 = vsel %vm235_vm0, %v2877_v16, %v253_v13  ;;  %v1645_v13 = vadd.f32 %v1629_v17, %v2752_v36  ;;  %v1644_v8 = vadd.f32 %v2666_v37, %v2624_v7 }
 0x13b   : > { %1449 = vmatpush1.bf16.msra.mxu1 %v2479_v25  ;;  %1535 = vmatpush1.bf16.msra.mxu0 %v2482_v5  ;;  %v1759_v25 = vmax.f32 %v1741_v14, %v2738_v26  ;;  %v2902_v5 = vmax.f32 %v1743_v15, %v1751_v18  ;;  %v1787_v1 = vsel %vm1681_vm5, %v2929_v43, %v2899_v24 }
 0x13c   : > { %1450 = vmatprep.subr.bf16.mxu1 %v2487_v29  ;;  %1536 = vmatprep.subr.bf16.mxu0 %v2490_v30  ;;  %v1754_v30 = vsel %vm225_vm1, %v2671_v40, %v2869_v10 }
 0x13f   : > { %1451 = vmatpush1.bf16.msra.mxu1 %v2485_v32  ;;  %1537 = vmatpush1.bf16.msra.mxu0 %v2488_v33  ;;  %v1675_v32 = vadd.f32 %v1629_v17, %v2738_v26  ;;  %v1673_v33 = vadd.f32 %v1661_v23, %v2738_v26 }
 0x140   : > { %1452 = vmatprep.subr.bf16.mxu1 %v2493_v39  ;;  %1538 = vmatprep.subr.bf16.mxu0 %v2496_v41  ;;  %v1685_v39 = vsel %vm1681_vm5, %v1682_v19, %v2886_v20  ;;  %v2555_v41 = vld [vmem:[%s2604_s18] sm:$0xff] }
 0x143   : > { %1453 = vmatpush1.bf16.msra.mxu1 %v2491_v42  ;;  %1539 = vmatpush1.bf16.msra.mxu0 %v2494_v45  ;;  %v1708_v42 = vrot.slane %v2555_v41, 4  ;;  %v2922_v45 = vrot.slane %v2565_v4, 4 }
 0x144   : > { %1454 = vmatprep.subr.bf16.mxu1 %v2499_v47  ;;  %1540 = vmatprep.subr.bf16.mxu0 %v2502_v49  ;;  %v2924_v47 = vmax.f32 %v1744_v22, %v1752_v35  ;;  %v1769_v49 = vsel %vm235_vm0, %v2877_v16, %v239_v11  ;;  %v1699_v11 = vadd.f32 %v1682_v19, %v1673_v33 }
 0x147   : > { %1455 = vmatpush1.bf16.msra.mxu1 %v2497_v50  ;;  %1541 = vmatpush1.bf16.msra.mxu0 %v2500_v51  ;;  %v1777_v50 = vmax.f32 %v1759_v25, %v2877_v16  ;;  %v1779_v51 = vmax.f32 %v2902_v5, %v1768_v31  ;;  %v1709_v31 = vrot.slane %v2889_v21, 4 }
 0x148   : > { %1456 = vmatprep.subr.bf16.mxu1 %v2505_v52  ;;  %1542 = vmatprep.subr.bf16.mxu0 %v2508_v53  ;;  %v1701_v53 = vadd.f32 %v1685_v39, %v1675_v32 }
 0x14b   : > { %1457 = vmatpush1.bf16.msra.mxu1 %v2503_v54  ;;  %1543 = vmatpush1.bf16.msra.mxu0 %v2506_v55  ;;  %v1786_v54 = vsel %vm1681_vm5, %v1682_v19, %v2899_v24  ;;  %v1711_v55 = vsel %vm1707_vm6, %v1708_v42, %v2922_v45 }
 0x14c   : > { %1458 = vmatprep.subr.bf16.mxu1 %v2511_v56  ;;  %1544 = vmatprep.subr.bf16.mxu0 %v2514_v57  ;;  %v1742_v56 = vmax.f32 %v2624_v7, -1e+30  ;;  %v1780_v57 = vmax.f32 %v2924_v47, %v1769_v49 }
 0x14e   : > { %v1760_v14 = vmax.f32 %v1742_v56, %v2666_v37  ;;  %v2970_v15 = vmax.f32 %v1780_v57, %v1787_v1 }
 0x14f   : > { %1459 = vmatpush1.bf16.msra.mxu1 %v2509_v59  ;;  %1545 = vmatpush1.bf16.msra.mxu0 %v2512_v60  ;;  %v1646_v59 = vadd.f32 %v1630_v34, %v2679_v44  ;;  %v1662_v44 = vsel %vm1659_vm4, %v2872_v12, %v2624_v7 }
 0x150   : > { %1460 = vmatprep.subr.bf16.mxu1 %v2517_v63  ;;  %1546 = vmatprep.subr.bf16.mxu0 %v2520_v2  ;;  %v1643_v63 = vadd.f32 %v2738_v26, %v2683_v46  ;;  %v1794_v2 = vmax.f32 %v1777_v50, %v1682_v19  ;;  %v1676_v46 = vadd.f32 %v1630_v34, %v2666_v37  ;;  %v1653_v19 = vmul.f32 0.33333334, %v1645_v13  ;;  %v3009_v13 = vld [vmem:[%s2604_s18 + $0x10] sm:$0xff] }
 0x151   : > { %v1725_v26 = vadd.f32 %v1708_v42, %v1699_v11  ;;  %v2972_v36 = vmul.f32 0.33333334, %v1646_v59  ;;  %v1674_v7 = vadd.f32 %v1662_v44, %v2666_v37  ;;  %v1778_v42 = vmax.f32 %v1760_v14, %v2877_v16 }
 0x152   : > { %v1651_v18 = vmul.f32 0.33333334, %v1643_v63  ;;  %v1838_v22 = vrot.slane %v1794_v2, 1  ;;  %v1745_v34 = vmax.f32 %v2710_v62, -1e+30  ;;  %v2992_v37 = vsel %vm235_vm0, %v2877_v16, %v251_v61 }
 0x153   : > { %1461 = vmatpush1.bf16.msra.mxu1 %v2515_v3  ;;  %1547 = vmatpush1.bf16.msra.mxu0 %v2518_v6  ;;  %v1796_v3 = vmax.f32 %v1779_v51, %v1786_v54  ;;  %v1727_v6 = vadd.f32 %v1711_v55, %v1701_v53  ;;  %v2984_v41 = vmul.f32 0.2, %v1725_v26  ;;  %v2997_v53 = vadd.f32 %v2902_v5, %v1653_v19 }
 0x154   : > { %v2994_v50 = vadd.f32 %v1759_v25, %v1651_v18  ;;  %v1700_v61 = vadd.f32 %v2929_v43, %v1674_v7  ;;  %v1712_v5 = vsel %vm1707_vm6, %v1709_v31, %v2922_v45  ;;  %v3006_v63 = vmax.f32 %v1778_v42, %v2929_v43 }
 0x155   : > { %v1839_v23 = vrot.slane %v1796_v3, 1  ;;  %v1735_v35 = vmul.f32 0.2, %v1727_v6  ;;  %v1747_v2 = vmax.f32 %v3009_v13, %v2710_v62  ;;  %v1753_v3 = vsel %vm225_vm1, %v2741_v27, %v2869_v10 }
 0x156   : > { %1479 = vmatmul.mubr.bf16.vlgmr.msra.gmra.mrb[4].mxu1 %v922_v28  ;;  %1565 = vmatmul.mubr.bf16.vlgmr.msra.gmra.mrb[8].mxu0 %v922_v28  ;;  %v2905_v28 = vld [vmem:[%s2604_s18 + $0x18] sm:$0xff]  ;;  %v1633_v26 = vadd.f32 %v3009_v13, %v2710_v62  ;;  %v1746_v18 = vmax.f32 %v2628_v9, -1e+30  ;;  %v1726_v19 = vadd.f32 %v1709_v31, %v1700_v61 }
 0x157   : > { %v1748_v29 = vmax.f32 %v2905_v28, %v2628_v9  ;;  %v1634_v52 = vadd.f32 %v2905_v28, %v2628_v9  ;;  %v3000_v58 = vsel %vm1659_vm4, %v1838_v22, %v1839_v23  ;;  %v1687_v22 = vrot.slane %v3009_v13, 3 }
 0x158   : > { %v1679_v31 = vadd.f32 %v1633_v26, %v2741_v27  ;;  %v3039_v42 = vmax.f32 %v1746_v18, %v2671_v40 }
 0x159   : > { %v2937_v4 = vmax.f32 %v1748_v29, %v1754_v30  ;;  %v1650_v60 = vadd.f32 %v1634_v52, %v2689_v48  ;;  %v1652_v29 = vmul.f32 0.33333334, %v1644_v8  ;;  %v1686_v30 = vsel %vm1681_vm5, %v2929_v43, %v2886_v20 }
 0x15a   : > { %v2982_v32 = vadd.f32 %v1634_v52, %v2671_v40  ;;  %v1702_v55 = vadd.f32 %v1686_v30, %v1676_v46  ;;  %v3017_v8 = vmax.f32 %v1745_v34, %v2741_v27  ;;  %v1663_v43 = vsel %vm1659_vm4, %v2872_v12, %v2710_v62 }
 0x15b   : > { %v1784_v48 = vmax.f32 %v2937_v4, %v2947_v0  ;;  %v2974_v17 = vmul.f32 0.33333334, %v1650_v60  ;;  %v3022_v46 = vadd.f32 %v1839_v23, %v1735_v35  ;;  %v3028_v7 = vadd.f32 %v1760_v14, %v1652_v29 }
 0x15c   : > { %v1728_v10 = vadd.f32 %v1712_v5, %v1702_v55  ;;  %v3030_v30 = vmax.f32 %v1747_v2, %v1753_v3  ;;  %v1841_v23 = vrot.slane %v3006_v63, 1  ;;  %v1842_v35 = vrot.slane %v2970_v15, 1 }
 0x15d   : > { %v1664_v14 = vsel %vm1659_vm4, %v2872_v12, %v2628_v9  ;;  %v1688_v29 = vrot.slane %v2905_v28, 3  ;;  %v3045_v34 = vmul.f32 0.2, %v1726_v19  ;;  %v1713_v12 = vrot.slane %v3009_v13, 4 }
 0x15e   : > { %v1788_v61 = vsel %vm1681_vm5, %v1687_v22, %v2899_v24  ;;  %v1843_v0 = vsel %vm1659_vm4, %v1841_v23, %v1842_v35 }
 0x15f   : > { %v1789_v13 = vsel %vm1681_vm5, %v1688_v29, %v2899_v24 }
 0x160   : > { %v1801_v24 = vmax.f32 %v1784_v48, %v1789_v13 }
 0x229   : > { %v1480_v33 = vpop.f32.mrb[4].mxu1  ;;  %v1566_v39 = vpop.f32.mrb[8].mxu0 }
 0x22a   : > { %v2229_v49 = vmul.f32 -1.442695, %v1480_v33  ;;  %v2231_v21 = vmul.f32 -1.442695, %v1566_v39  ;;  %v1482_v51 = vpop.f32.mrb[5].mxu1  ;;  %v1568_v52 = vpop.f32.mrb[9].mxu0  ;;  %v1677_v33 = vadd.f32 %v1663_v43, %v2741_v27  ;;  %v1781_v39 = vmax.f32 %v3017_v8, %v2877_v16 }
 0x22b   : > { %v2230_v54 = vmul.f32 -1.442695, %v1482_v51  ;;  %v2232_v11 = vmul.f32 -1.442695, %v1568_v52  ;;  %v1484_v56 = vpop.f32.mrb[6].mxu1  ;;  %v1570_v57 = vpop.f32.mrb[10].mxu0  ;;  %v1689_v51 = vsel %vm1681_vm5, %v1687_v22, %v2886_v20 }
 0x22c   : > { %2521 = vpow2.f32 %v2229_v49  ;;  %v2233_v25 = vmul.f32 -1.442695, %v1484_v56  ;;  %v1486_v59 = vpop.f32.mrb[7].mxu1  ;;  %v1572_v60 = vpop.f32.mrb[11].mxu0  ;;  %v2235_v1 = vmul.f32 -1.442695, %v1570_v57  ;;  %v1703_v55 = vadd.f32 %v1687_v22, %v1677_v33 }
 0x22d   : > { %2523 = vpow2.f32 %v2231_v21  ;;  %v2234_v6 = vmul.f32 -1.442695, %v1486_v59  ;;  %v2236_v44 = vmul.f32 -1.442695, %v1572_v60  ;;  %v3047_v49 = vmul.f32 0.2, %v1728_v10 }
 0x22e   : > { %2525 = vpow2.f32 %v2230_v54  ;;  %v1647_v21 = vadd.f32 %v2741_v27, %v2710_v62  ;;  %v1649_v54 = vadd.f32 %v1633_v26, %v2757_v38  ;;  %v1678_v62 = vadd.f32 %v1664_v14, %v2671_v40 }
 0x22f   : > { %2527 = vpow2.f32 %v2232_v11  ;;  %v1783_v11 = vmax.f32 %v3030_v30, %v2992_v37  ;;  %v1705_v60 = vadd.f32 %v1689_v51, %v1679_v31  ;;  %v1782_v38 = vmax.f32 %v3039_v42, %v2877_v16 }
 0x230   : > { %2529 = vpow2.f32 %v2233_v25  ;;  %v1798_v25 = vmax.f32 %v1781_v39, %v1687_v22  ;;  %v1690_v37 = vsel %vm1681_vm5, %v1688_v29, %v2886_v20  ;;  %v1704_v26 = vadd.f32 %v1688_v29, %v1678_v62 }
 0x231   : > { %2531 = vpow2.f32 %v2235_v1  ;;  %v1714_v1 = vrot.slane %v2905_v28, 4  ;;  %v1800_v43 = vmax.f32 %v1783_v11, %v1788_v61  ;;  %v1706_v20 = vadd.f32 %v1690_v37, %v2982_v32 }
 0x232   : > { %2533 = vpow2.f32 %v2234_v6  ;;  %v1715_v6 = vsel %vm1707_vm6, %v1713_v12, %v2922_v45  ;;  %v1799_v28 = vmax.f32 %v1782_v38, %v1688_v29  ;;  %v1648_v33 = vadd.f32 %v2671_v40, %v2628_v9 }
 0x233   : > { %2535 = vpow2.f32 %v2236_v44  ;;  %v1716_v39 = vsel %vm1707_vm6, %v1714_v1, %v2922_v45  ;;  %v1729_v31 = vadd.f32 %v1713_v12, %v1703_v55  ;;  %v1731_v32 = vadd.f32 %v1715_v6, %v1705_v60 }
 0x234   : > { %v1844_v51 = vrot.slane %v1798_v25, 1  ;;  %v1730_v29 = vadd.f32 %v1714_v1, %v1704_v26  ;;  %v1732_v48 = vadd.f32 %v1716_v39, %v1706_v20  ;;  %v1847_v11 = vrot.slane %v1799_v28, 1 }
 0x235   : > { %v1858_v9 = vadd.f32 %v3000_v58, %v2984_v41  ;;  %v1805_v40 = vadd.f32 %v2924_v47, %v2972_v36  ;;  %v1655_v45 = vmul.f32 0.33333334, %v1647_v21  ;;  %v1657_v55 = vmul.f32 0.33333334, %v1649_v54 }
 0x236   : > { %v2522_v52 = vpop.eup %2521  ;;  %v1737_v12 = vmul.f32 0.2, %v1729_v31  ;;  %v1656_v61 = vmul.f32 0.33333334, %v1648_v33  ;;  %v1859_v62 = vadd.f32 %v1843_v0, %v3045_v34  ;;  %v1861_v23 = vadd.f32 %v1842_v35, %v3047_v49 }
 0x237   : > { %v2524_v56 = vpop.eup %2523  ;;  %v1599_v57 = vadd.f32 1.0, %v2522_v52  ;;  %v1845_v52 = vrot.slane %v1800_v43, 1  ;;  %v1740_v47 = vmul.f32 0.2, %v1732_v48  ;;  %v1806_v60 = vadd.f32 %v3017_v8, %v1655_v45 }
 0x238   : > { %v2526_v27 = vpop.eup %2525  ;;  %v1601_v59 = vadd.f32 1.0, %v2524_v56  ;;  %v1848_v56 = vrot.slane %v1801_v24, 1  ;;  %v1808_v38 = vadd.f32 %v3030_v30, %v1657_v55  ;;  %v1809_v34 = vadd.f32 %v2937_v4, %v2974_v17 }
 0x239   : > { %v2528_v5 = vpop.eup %2527  ;;  %2537 = vrcp.f32 %v1599_v57  ;;  %v1600_v63 = vadd.f32 1.0, %v2526_v27  ;;  %v1739_v57 = vmul.f32 0.2, %v1731_v32  ;;  %v1846_v27 = vsel %vm1659_vm4, %v1844_v51, %v1845_v52 }
 0x23a   : > { %v2530_v2 = vpop.eup %2529  ;;  %2539 = vrcp.f32 %v1601_v59  ;;  %v1602_v3 = vadd.f32 1.0, %v2528_v5  ;;  %v1738_v59 = vmul.f32 0.2, %v1730_v29  ;;  %v1849_v36 = vsel %vm1659_vm4, %v1847_v11, %v1848_v56 }
 0x23b   : > { %v2532_v44 = vpop.eup %2531  ;;  %2541 = vrcp.f32 %v1600_v63  ;;  %v1603_v16 = vadd.f32 1.0, %v2530_v2  ;;  %v1862_v49 = vadd.f32 %v1846_v27, %v1737_v12  ;;  %v1864_v37 = vadd.f32 %v1845_v52, %v1739_v57 }
 0x23c   : > { %v2534_v18 = vpop.eup %2533  ;;  %2543 = vrcp.f32 %v1602_v3  ;;  %v1605_v19 = vadd.f32 1.0, %v2532_v44  ;;  %v1807_v5 = vadd.f32 %v3039_v42, %v1656_v61  ;;  %v1863_v3 = vadd.f32 %v1849_v36, %v1738_v59 }
 0x23d   : > { %v2536_v10 = vpop.eup %2535  ;;  %2545 = vrcp.f32 %v1603_v16  ;;  %v1604_v22 = vadd.f32 1.0, %v2534_v18  ;;  %v1865_v44 = vadd.f32 %v1848_v56, %v1740_v47 }
 0x23e   : > { %2547 = vrcp.f32 %v1605_v19  ;;  %v1606_v14 = vadd.f32 1.0, %v2536_v10 }
 0x23f   : > { %2549 = vrcp.f32 %v1604_v22 }
 0x240   : > { %2551 = vrcp.f32 %v1606_v14 }
 0x243   : > { %v2538_v25 = vpop.eup %2537 }
 0x244   : > { %v2540_v41 = vpop.eup %2539  ;;  %v1814_v58 = vrot.slane %v2538_v25, 1 }
 0x245   : > { %v2542_v21 = vpop.eup %2541  ;;  %v1870_v54 = vrot.slane %v2540_v41, 2 }
 0x246   : > { %v2544_v15 = vpop.eup %2543  ;;  %v1815_v35 = vrot.slane %v2542_v21, 1  ;;  %v1822_v8 = vmul.f32 %v1814_v58, %v2994_v50  ;;  %v1824_v18 = vmul.f32 %v1814_v58, %v2997_v53 }
 0x247   : > { %v2546_v63 = vpop.eup %2545  ;;  %v1878_v1 = vmul.f32 %v1870_v54, %v1858_v9  ;;  %v1880_v13 = vmul.f32 %v1870_v54, %v3022_v46  ;;  %v1871_v2 = vrot.slane %v2544_v15, 2 }
 0x248   : > { %v2548_v6 = vpop.eup %2547  ;;  %v1825_v43 = vmul.f32 %v1815_v35, %v1805_v40  ;;  %v1816_v30 = vrot.slane %v2546_v63, 1  ;;  %v1823_v42 = vmul.f32 %v1815_v35, %v3028_v7 }
 0x249   : > { %v2550_v16 = vpop.eup %2549  ;;  %v1894_v4 = vrot.slane %v1878_v1, 7  ;;  %v1896_v17 = vrot.slane %v1880_v13, 7  ;;  %v1879_v26 = vmul.f32 %v1871_v2, %v1859_v62  ;;  %v1881_v20 = vmul.f32 %v1871_v2, %v1861_v23 }
 0x24a   : > { %v1872_v19 = vrot.slane %v2548_v6, 2  ;;  %v1817_v28 = vrot.slane %v2550_v16, 1  ;;  %v2552_v50 = vpop.eup %2551  ;;  %v1826_v39 = vmul.f32 %v1816_v30, %v1806_v60  ;;  %v1828_v9 = vmul.f32 %v1816_v30, %v1808_v38 }
 0x24b   : > { %v1897_v46 = vsel %vm235_vm0, %v1894_v4, %v1896_v17  ;;  %v1914_v24 = vadd.f32 %v1894_v4, %v1822_v8  ;;  %v1895_v10 = vrot.slane %v1879_v26, 7  ;;  %v1898_v22 = vrot.slane %v1881_v20, 7 }
 0x24c   : > { %v1916_v33 = vadd.f32 %v1897_v46, %v1824_v18  ;;  %v1882_v31 = vmul.f32 %v1872_v19, %v1862_v49  ;;  %v1884_v32 = vmul.f32 %v1872_v19, %v1864_v37  ;;  %v1829_v53 = vmul.f32 %v1817_v28, %v1809_v34 }
 0x24d   : > { %v1923_v14 = vsel %vm1922_vm7, %v1914_v24, -inf  ;;  %v1899_v51 = vsel %vm235_vm0, %v1895_v10, %v1898_v22  ;;  %v1915_v52 = vadd.f32 %v1895_v10, %v1823_v42  ;;  %v1873_v40 = vrot.slane %v2552_v50, 2 }
 0x24e   : > { %v1924_v7 = vsel %vm1659_vm4, %v1916_v33, -inf  ;;  %v1917_v29 = vadd.f32 %v1899_v51, %v1825_v43  ;;  %v1900_v0 = vrot.slane %v1882_v31, 7  ;;  %v1902_v48 = vrot.slane %v1884_v32, 7 }
 0x24f   : > { %v1925_v11 = vmax.f32 %v1923_v14, %v1924_v7  ;;  %v1932_v56 = vsel %vm1922_vm7, %v1915_v52, -inf  ;;  %v1883_v62 = vmul.f32 %v1873_v40, %v1863_v3  ;;  %v1827_v27 = vmul.f32 %v1817_v28, %v1807_v5 }
 0x250   : > { %v1933_v45 = vsel %vm1659_vm4, %v1917_v29, -inf  ;;  %v1903_v55 = vsel %vm235_vm0, %v1900_v0, %v1902_v48  ;;  %v1918_v12 = vadd.f32 %v1900_v0, %v1826_v39  ;;  %v1885_v59 = vmul.f32 %v1873_v40, %v1865_v44 }
 0x251   : > { %v1926_v57 = vrot.slane %v1925_v11, 4  ;;  %v1934_v61 = vmax.f32 %v1932_v56, %v1933_v45  ;;  %v1920_v25 = vadd.f32 %v1903_v55, %v1828_v9  ;;  %v1901_v36 = vrot.slane %v1883_v62, 7 }
 0x252   : > { %v1941_v23 = vsel %vm1922_vm7, %v1918_v12, -inf  ;;  %v1904_v54 = vrot.slane %v1885_v59, 7  ;;  %v2568_v20 = vmov 1983009808   ;;  %v1967_v42 = vlaneseq }
 0x253   : > { %v1927_v41 = vmax.f32 %v1925_v11, %v1926_v57  ;;  %v1935_v58 = vrot.slane %v1934_v61, 4  ;;  %v1942_v47 = vsel %vm1659_vm4, %v1920_v25, -inf  ;;  %v1919_v34 = vadd.f32 %v1901_v36, %v1827_v27 }
 0x254   : > { %v1943_v21 = vmax.f32 %v1941_v23, %v1942_v47  ;;  %v1905_v35 = vsel %vm235_vm0, %v1901_v36, %v1904_v54  ;;  %v1965_v18 = vunpack.c.l.s4 %v2568_v20  ;;  %v1968_v10 = vshrl.u32 %v1967_v42, 7 }
 0x255   : > { %v1928_v60 = vrot.slane %v1927_v41, 2  ;;  %v1936_v38 = vmax.f32 %v1934_v61, %v1935_v58  ;;  %v1921_v63 = vadd.f32 %v1905_v35, %v1829_v53  ;;  %v1950_v1 = vsel %vm1922_vm7, %v1919_v34, -inf }
 0x256   : > { %v1944_v15 = vrot.slane %v1943_v21, 4  ;;  %v1966_v24 = vunpack.c.0.s8 %v1965_v18 }
 0x257   : > { %v1929_v49 = vmax.f32 %v1927_v41, %v1928_v60  ;;  %v1937_v37 = vrot.slane %v1936_v38, 2  ;;  %v1951_v3 = vsel %vm1659_vm4, %v1921_v63, -inf }
 0x258   : > { %v1945_v5 = vmax.f32 %v1943_v21, %v1944_v15  ;;  %v1952_v8 = vmax.f32 %v1950_v1, %v1951_v3  ;;  %v1969_v39 = vsub.s32 %v1966_v24, %v1968_v10 }
 0x259   : > { %v1930_v13 = vrot.slane %v1929_v49, 1  ;;  %v1938_v2 = vmax.f32 %v1936_v38, %v1937_v37 }
 0x25a   : > { %v1946_v6 = vrot.slane %v1945_v5, 2  ;;  %v1953_v16 = vrot.slane %v1952_v8, 4 }
 0x25b   : > { %v1931_v43 = vmax.f32 %v1929_v49, %v1930_v13  ;;  %v1939_v30 = vrot.slane %v1938_v2, 1 }
 0x25c   : > { %v1947_v44 = vmax.f32 %v1945_v5, %v1946_v6  ;;  %v1954_v17 = vmax.f32 %v1952_v8, %v1953_v16 }
 0x25d   : > { %v1940_v4 = vmax.f32 %v1938_v2, %v1939_v30 }
 0x25e   : > { %v1948_v19 = vrot.slane %v1947_v44, 1  ;;  %v1955_v28 = vrot.slane %v1954_v17, 2 }
 0x25f   : > { %v1963_v26 = vcombine.low %v1931_v43, %v1940_v4 }
 0x260   : > { %v1956_v46 = vmax.f32 %v1954_v17, %v1955_v28  ;;  %v1949_v22 = vmax.f32 %v1947_v44, %v1948_v19 }
 0x261   : > { %v1970_v14 = vrot.slane %v1963_v26, %v1969_v39 }
 0x262   : > { %v1957_v50 = vrot.slane %v1956_v46, 1 }
 0x264   : > { %v1958_v33 = vmax.f32 %v1956_v46, %v1957_v50 }
 0x266   : > { %v1971_v31 = vcombine.low %v1949_v22, %v1958_v33 }
 0x268   : > { %v1978_v32 = vrot.slane %v1971_v31, %v1969_v39 }
 0x26a   : > { %v1983_v51 = vrot.slane %v1978_v32, 7 }
 0x26c   : > { %v1985_v52 = vsel %vm1984_vm8, %v1983_v51, %v1970_v14 }
 0x26d   : > { %v1987_v53 = vsel %vm1986_vm9, %v1983_v51, %v1985_v52 }
 0x26e   : > { %v1989_v7 = vsel %vm1988_vm10, %v1983_v51, %v1987_v53 }
 0x26f   : > { %v1990_v29 = vsel %vm1922_vm7, %v1983_v51, %v1989_v7 }
 0x270   : > { %1992 = vst [vmem:[%s210_s29] sm:$0xf] %v1990_v29 }
 0x271 PF: > { %s13_s12 = sadd.s32 1, %s2563_s12  }
 0x272   : > { %p10_p4 = scmp.ge.s32.totalorder %s13_s12, 4  }
 0x274   :  { %12 = sbr.rel (!%p10_p4) target bundleno = 1 (0x1), region = 68 }

</bundles_post_ra>
